<compile_context>
chip_gen: v6e
topology: v6e:2x2x1
jax: 0.10.0
libtpu: 0.0.40
codegen_flags: <defaults>
</compile_context>

<pallas_src>
import jax
import jax.numpy as jnp
from jax.experimental import pallas as pl
from jax.experimental.pallas import tpu as pltpu

LANE = 128
MAX_TM = 2048          # max columns (lanes) per grid step


def _round_up(x, m):
    return (x + m - 1) // m * m


def conv_relu_maxpool_kernel(patch_ref, w_ref, o_ref):
    # patch_ref: (4, KCp, TM)  im2col patches, one slab per 2x2 pool position;
    #                          row 27 of each slab is 1.0 (bias folded into matmul).
    # w_ref:     (Cout, KCp)   flattened conv weights; column 27 holds the bias.
    # o_ref:     (Cout, TM)    pooled + biased + ReLU'd output columns.
    w = w_ref[...]
    y = jnp.dot(w, patch_ref[0], preferred_element_type=jnp.float32)
    for p in range(1, 4):                      # static unroll, max fused per matmul
        y = jnp.maximum(
            y, jnp.dot(w, patch_ref[p], preferred_element_type=jnp.float32))
    # relu(max_p(conv_p) + b) == max_p(relu(conv_p + b)): per-channel const + monotone.
    o_ref[...] = jnp.maximum(y, 0.0)


def cnn_forward(x, w, b):
    """x: (N, Cin, H, W) f32, w: (Cout, Cin, 3, 3) f32, b: (Cout,) f32."""
    N, Cin, H, W = x.shape
    Cout = w.shape[0]
    K = 3
    assert H % 2 == 0 and W % 2 == 0, "MaxPool2d(2,2) here requires even H, W"
    Hp, Wp = H // 2, W // 2
    M = Hp * Wp
    L = N * M                        # batch folded into the lane (column) axis
    KC = Cin * K * K                 # 27
    KCp = _round_up(KC + 1, 8)       # +1 ones-row for the bias -> 32 (sublane mult)

    TM = min(MAX_TM, _round_up(L, LANE))
    Lp = _round_up(L, TM)

    # ---- glue (plain JAX): padded im2col, pool-position-major, batch in lanes ----
    xp = jnp.pad(x, ((0, 0), (0, 0), (1, 1), (1, 1)))
    cols = jnp.stack([xp[:, :, kh:kh + H, kw:kw + W]
                      for kh in range(K) for kw in range(K)], axis=2)     # (N,Cin,9,H,W)
    cols = cols.reshape(N, KC, Hp, 2, Wp, 2)
    cols = cols.transpose(3, 5, 1, 0, 2, 4).reshape(4, KC, L)             # (4,27,N*M)
    cols = jnp.concatenate([cols, jnp.ones((4, 1, L), jnp.float32)], 1)   # bias row
    cols = jnp.pad(cols, ((0, 0), (0, KCp - KC - 1), (0, Lp - L)))        # (4,KCp,Lp)

    wmat = jnp.concatenate(
        [w.reshape(Cout, KC), b[:, None].astype(jnp.float32),
         jnp.zeros((Cout, KCp - KC - 1), jnp.float32)], axis=1)           # (Cout,KCp)

    out = pl.pallas_call(
        conv_relu_maxpool_kernel,
        out_shape=jax.ShapeDtypeStruct((Cout, Lp), jnp.float32),
        grid_spec=pltpu.PrefetchScalarGridSpec(
            num_scalar_prefetch=0,
            grid=(Lp // TM,),                         # column-block grid (1 step here)
            in_specs=[
                pl.BlockSpec((4, KCp, TM), lambda i: (0, 0, i)),
                pl.BlockSpec((Cout, KCp), lambda i: (0, 0)),   # weights resident
            ],
            out_specs=pl.BlockSpec((Cout, TM), lambda i: (0, i)),
        ),
        compiler_params=pltpu.CompilerParams(
            dimension_semantics=("parallel",)),
    )(cols, wmat)

    # (Cout, L) with column order (n, hp, wp) -> torch's x.view(N, -1) order (n, c, m).
    out = out[:, :L].reshape(Cout, N, M).transpose(1, 0, 2)
    return out.reshape(N, Cout * M)


def reference(x, w, b):
    y = jax.lax.conv_general_dilated(
        x, w, window_strides=(1, 1), padding=((1, 1), (1, 1)),
        dimension_numbers=("NCHW", "OIHW", "NCHW"))
    y = jnp.maximum(y + b[None, :, None, None], 0.0)
    y = jax.lax.reduce_window(y, -jnp.inf, jax.lax.max,
                              (1, 1, 2, 2), (1, 1, 2, 2), "VALID")
    return y.reshape(y.shape[0], -1)


if __name__ == "__main__":
    key = jax.random.PRNGKey(0)
    kx, kw, kb = jax.random.split(key, 3)

    N, Cin, H, W = 2, 3, 16, 16          # small spatial; module fixes Cin=3, Cout=16
    Cout = 16

    x = jax.random.normal(kx, (N, Cin, H, W), dtype=jnp.float32)
    w = jax.random.normal(kw, (Cout, Cin, 3, 3), dtype=jnp.float32) * 0.1
    b = jax.random.normal(kb, (Cout,), dtype=jnp.float32) * 0.1

    out = jax.jit(cnn_forward)(x, w, b)
    out = jax.block_until_ready(out)

    ref = reference(x, w, b)
    assert out.shape == (N, Cout * (H // 2) * (W // 2)), out.shape
    assert jnp.allclose(out, ref, atol=1e-4, rtol=1e-4), "mismatch vs reference"

    print("KERNEL_OK")
</pallas_src>

<mosaic_0001>
module attributes {stable_mosaic.version = 11 : i64} {
  func.func @conv_relu_maxpool_kernel(%arg0: i32, %arg1: memref<4x32x128xf32, #tpu.memory_space<vmem>>, %arg2: memref<16x32xf32, #tpu.memory_space<vmem>>, %arg3: memref<16x128xf32, #tpu.memory_space<vmem>>) attributes {dimension_semantics = [#tpu.dimension_semantics<parallel>], iteration_bounds = array<i64: 1>, scalar_prefetch = 0 : i64, scratch_operands = 0 : i64, tpu.core_type = #tpu.core_type<tc>, window_params = [{transform_indices = @transform_0, window_bounds = array<i64: 4, 32, 128>}, {pipeline_mode = #tpu.pipeline_mode<synchronous>, transform_indices = @transform_1, window_bounds = array<i64: 16, 32>}, {transform_indices = @transform_2, window_bounds = array<i64: 16, 128>}]} {
    %c0 = arith.constant 0 : index
    %c0_0 = arith.constant 0 : index
    %0 = vector.load %arg2[%c0, %c0_0] : memref<16x32xf32, #tpu.memory_space<vmem>>, vector<16x32xf32>
    %c0_1 = arith.constant 0 : index
    %c0_2 = arith.constant 0 : index
    %c0_3 = arith.constant 0 : index
    %1 = vector.load %arg1[%c0_1, %c0_2, %c0_3] : memref<4x32x128xf32, #tpu.memory_space<vmem>>, vector<1x32x128xf32>
    %2 = vector.shape_cast %1 : vector<1x32x128xf32> to vector<32x128xf32>
    %cst = arith.constant dense<0.000000e+00> : vector<16x128xf32>
    %3 = tpu.matmul %0, %2, %cst {dimension_numbers = #tpu.dot_dimension_numbers<[1], [0], [0], [1], [0, 0, 1, 1], [], []>} : vector<16x32xf32>, vector<32x128xf32>, vector<16x128xf32> -> vector<16x128xf32>
    %c1 = arith.constant 1 : index
    %c0_4 = arith.constant 0 : index
    %c0_5 = arith.constant 0 : index
    %4 = vector.load %arg1[%c1, %c0_4, %c0_5] : memref<4x32x128xf32, #tpu.memory_space<vmem>>, vector<1x32x128xf32>
    %5 = vector.shape_cast %4 : vector<1x32x128xf32> to vector<32x128xf32>
    %cst_6 = arith.constant dense<0.000000e+00> : vector<16x128xf32>
    %6 = tpu.matmul %0, %5, %cst_6 {dimension_numbers = #tpu.dot_dimension_numbers<[1], [0], [0], [1], [0, 0, 1, 1], [], []>} : vector<16x32xf32>, vector<32x128xf32>, vector<16x128xf32> -> vector<16x128xf32>
    %7 = arith.maximumf %3, %6 : vector<16x128xf32>
    %c2 = arith.constant 2 : index
    %c0_7 = arith.constant 0 : index
    %c0_8 = arith.constant 0 : index
    %8 = vector.load %arg1[%c2, %c0_7, %c0_8] : memref<4x32x128xf32, #tpu.memory_space<vmem>>, vector<1x32x128xf32>
    %9 = vector.shape_cast %8 : vector<1x32x128xf32> to vector<32x128xf32>
    %cst_9 = arith.constant dense<0.000000e+00> : vector<16x128xf32>
    %10 = tpu.matmul %0, %9, %cst_9 {dimension_numbers = #tpu.dot_dimension_numbers<[1], [0], [0], [1], [0, 0, 1, 1], [], []>} : vector<16x32xf32>, vector<32x128xf32>, vector<16x128xf32> -> vector<16x128xf32>
    %11 = arith.maximumf %7, %10 : vector<16x128xf32>
    %c3 = arith.constant 3 : index
    %c0_10 = arith.constant 0 : index
    %c0_11 = arith.constant 0 : index
    %12 = vector.load %arg1[%c3, %c0_10, %c0_11] : memref<4x32x128xf32, #tpu.memory_space<vmem>>, vector<1x32x128xf32>
    %13 = vector.shape_cast %12 : vector<1x32x128xf32> to vector<32x128xf32>
    %cst_12 = arith.constant dense<0.000000e+00> : vector<16x128xf32>
    %14 = tpu.matmul %0, %13, %cst_12 {dimension_numbers = #tpu.dot_dimension_numbers<[1], [0], [0], [1], [0, 0, 1, 1], [], []>} : vector<16x32xf32>, vector<32x128xf32>, vector<16x128xf32> -> vector<16x128xf32>
    %15 = arith.maximumf %11, %14 : vector<16x128xf32>
    %cst_13 = arith.constant 0.000000e+00 : f32
    %16 = vector.broadcast %cst_13 : f32 to vector<16x128xf32>
    %17 = arith.maximumf %15, %16 : vector<16x128xf32>
    %c0_14 = arith.constant 0 : index
    %c0_15 = arith.constant 0 : index
    %18 = vector.load %arg3[%c0_14, %c0_15] : memref<16x128xf32, #tpu.memory_space<vmem>>, vector<16x128xf32>
    tpu.vector_store %arg3[%c0_14, %c0_15], %17 {strides = array<i32>} : memref<16x128xf32, #tpu.memory_space<vmem>>, vector<16x128xf32>,
    return
  }
  func.func @transform_0(%arg0: i32) -> (i32, i32, i32) {
    %c0_i32 = arith.constant 0 : i32
    %c0_i32_0 = arith.constant 0 : i32
    %c0_i32_1 = arith.constant 0 : i32
    return %c0_i32, %c0_i32_0, %arg0 : i32, i32, i32
  }
  func.func @transform_1(%arg0: i32) -> (i32, i32) {
    %c0_i32 = arith.constant 0 : i32
    %c0_i32_0 = arith.constant 0 : i32
    %c0_i32_1 = arith.constant 0 : i32
    return %c0_i32, %c0_i32_0 : i32, i32
  }
  func.func @transform_2(%arg0: i32) -> (i32, i32) {
    %c0_i32 = arith.constant 0 : i32
    %c0_i32_0 = arith.constant 0 : i32
    return %c0_i32, %arg0 : i32, i32
  }
}

</mosaic_0001>

<bundles_post_ra>
// kernel: cnn_forward.1
= control target key start
LH: loop header
LB: loop body
LE: loop exit
PB: predicated region body
PF: predicated region fallthrough
CT: control target
= control target key end

     0   :  { %vm17_vm0 = vcmask 261120   ;;  %s524_s0 = inlined_call_operand.vmem [shape: f32[4,32,128], index: 0, kind: input, shape index: {}]   ;;  %s525_s1 = inlined_call_operand.vmem [shape: f32[16,32], index: 1, kind: input, shape index: {}]   ;;  %s526_s2 = inlined_call_operand.vmem [shape: f32[16,128], index: 2, kind: output, shape index: {}]  }
   0x1   :  { %v16_v0 = vld [vmem:[%s524_s0 + $0x18] sm:$0xff]  ;;  %v15_v2 = vld [vmem:[%s524_s0 + $0x10] sm:$0xff]  ;;  %v14_v4 = vld [vmem:[%s524_s0 + $0x8] sm:$0xff] }
   0x2   :  { %v358_v1 = vld [vmem:[%s524_s0 + $0x38] sm:$0xff]  ;;  %397 = vmatprep.subr.mxu0 %v16_v0  ;;  %v357_v3 = vld [vmem:[%s524_s0 + $0x30] sm:$0xff]  ;;  %v356_v5 = vld [vmem:[%s524_s0 + $0x28] sm:$0xff] }
   0x3   :  { %408 = vmatprep.subr.mxu1 %v358_v1  ;;  %398 = vmatpush3.msra.mxu0 %v16_v0  ;;  %v13_v6 = vld [vmem:[%s524_s0] sm:$0xff]  ;;  %v12_v9 = vld [vmem:[%s525_s1 + $0x8] sm:$0xff]  ;;  %v364_v10 = vld [vmem:[%s524_s0 + $0x58] sm:$0xff] }
   0x4   :  { %409 = vmatpush3.msra.mxu1 %v358_v1  ;;  %399 = vmatprep.subr.mxu0 %v15_v2  ;;  %v355_v7 = vld [vmem:[%s524_s0 + $0x20] sm:$0xff]  ;;  %v370_v11 = vld [vmem:[%s524_s0 + $0x78] sm:$0xff]  ;;  %v363_v12 = vld [vmem:[%s524_s0 + $0x50] sm:$0xff] }
   0x5   :  { %410 = vmatprep.subr.mxu1 %v357_v3  ;;  %400 = vmatpush3.msra.mxu0 %v15_v2  ;;  %v11_v8 = vld [vmem:[%s525_s1] sm:$0xff]  ;;  %v369_v13 = vld [vmem:[%s524_s0 + $0x70] sm:$0xff]  ;;  %v362_v14 = vld [vmem:[%s524_s0 + $0x48] sm:$0xff] }
   0x6   :  { %411 = vmatpush3.msra.mxu1 %v357_v3  ;;  %401 = vmatprep.subr.mxu0 %v14_v4  ;;  %v368_v15 = vld [vmem:[%s524_s0 + $0x68] sm:$0xff]  ;;  %v361_v16 = vld [vmem:[%s524_s0 + $0x40] sm:$0xff] }
   0x7   :  { %412 = vmatprep.subr.mxu1 %v356_v5  ;;  %402 = vmatpush3.msra.mxu0 %v14_v4  ;;  %v367_v17 = vld [vmem:[%s524_s0 + $0x60] sm:$0xff] }
   0x8   :  { %413 = vmatpush3.msra.mxu1 %v356_v5  ;;  %403 = vmatprep.subr.mxu0 %v13_v6 }
   0x9   :  { %414 = vmatprep.subr.mxu1 %v355_v7  ;;  %404 = vmatpush3.msra.mxu0 %v13_v6 }
   0xa   :  { %405 = vmatprep.mubr.msk.f32.mxu0 %vm17_vm0, %v11_v8  ;;  %415 = vmatpush3.msra.mxu1 %v355_v7 }
   0xb   :  { %416 = vmatprep.mubr.msk.f32.mxu1 %vm17_vm0, %v11_v8  ;;  %406 = vmatmul.mubr.msk.f32.vlgmr.msra.gmra.mxu0 %vm17_vm0, %v12_v9 }
   0xc   :  { %417 = vmatmul.mubr.msk.f32.vlgmr.msra.gmra.mxu1 %vm17_vm0, %v12_v9  ;;  %419 = vmatprep.subr.mxu0 %v364_v10 }
   0xd   :  { %430 = vmatprep.subr.mxu1 %v370_v11  ;;  %420 = vmatpush3.msra.mxu0 %v364_v10 }
   0xe   :  { %431 = vmatpush3.msra.mxu1 %v370_v11  ;;  %421 = vmatprep.subr.mxu0 %v363_v12 }
   0xf   :  { %432 = vmatprep.subr.mxu1 %v369_v13  ;;  %422 = vmatpush3.msra.mxu0 %v363_v12 }
  0x10   :  { %433 = vmatpush3.msra.mxu1 %v369_v13  ;;  %423 = vmatprep.subr.mxu0 %v362_v14 }
  0x11   :  { %434 = vmatprep.subr.mxu1 %v368_v15  ;;  %424 = vmatpush3.msra.mxu0 %v362_v14 }
  0x12   :  { %435 = vmatpush3.msra.mxu1 %v368_v15  ;;  %425 = vmatprep.subr.mxu0 %v361_v16 }
  0x13   :  { %436 = vmatprep.subr.mxu1 %v367_v17  ;;  %426 = vmatpush3.msra.mxu0 %v361_v16 }
  0x14   :  { %427 = vmatprep.mubr.msk.f32.mxu0 %vm17_vm0, %v11_v8  ;;  %437 = vmatpush3.msra.mxu1 %v367_v17 }
  0x15   :  { %438 = vmatprep.mubr.msk.f32.mxu1 %vm17_vm0, %v11_v8  ;;  %428 = vmatmul.mubr.msk.f32.vlgmr.msra.gmra.mxu0 %vm17_vm0, %v12_v9 }
  0x16   :  { %439 = vmatmul.mubr.msk.f32.vlgmr.msra.gmra.mxu1 %vm17_vm0, %v12_v9 }
  0xcb   :  { %v407_v18 = vpop.f32.mrf.mxu0 }
  0xcc   :  { %v418_v19 = vpop.f32.mrf.mxu1 }
  0xcd   :  { %v90_v20 = vpop.f32.mrf.mxu0  ;;  %v180_v22 = vmax.f32 %v407_v18, %v418_v19 }
  0xce   :  { %v170_v21 = vpop.f32.mrf.mxu1 }
  0xcf   :  { %v179_v25 = vmax.f32 %v90_v20, %v170_v21 }
  0xd5   :  { %v429_v23 = vpop.f32.mrf.mxu0 }
  0xd6   :  { %v440_v24 = vpop.f32.mrf.mxu1  ;;  %v262_v26 = vmax.f32 %v180_v22, %v429_v23 }
  0xd7   :  { %v252_v27 = vpop.f32.mrf.mxu0 }
  0xd8   :  { %v344_v28 = vmax.f32 %v262_v26, %v440_v24  ;;  %v261_v29 = vmax.f32 %v179_v25, %v252_v27  ;;  %v334_v30 = vpop.f32.mrf.mxu1 }
  0xda   :  { %v346_v31 = vmax.f32 %v344_v28, 0.0  ;;  %v343_v32 = vmax.f32 %v261_v29, %v334_v30 }
  0xdc   :  { %348 = vst [vmem:[%s526_s2 + $0x8] sm:$0xff] %v346_v31  ;;  %v345_v33 = vmax.f32 %v343_v32, 0.0 }
  0xde   :  { %347 = vst [vmem:[%s526_s2] sm:$0xff] %v345_v33 }

</bundles_post_ra>
